<compile_context>
chip_gen: v7x
topology: tpu7x:2x2x1
jax: 0.10.0
libtpu: 0.0.40
codegen_flags: <defaults>
</compile_context>

<pallas_src>
import jax
import jax.numpy as jnp
from jax.experimental import pallas as pl
from jax.experimental.pallas import tpu as pltpu


def _mlp_kernel(x_ref, w1_ref, b1_ref, w2_ref, b2_ref, w3_ref, b3_ref, o_ref):
    # x_ref: (13, TILE_B) bf16, feature-major (batch on lanes).
    x = x_ref[...]

    # Layer 1: [64,13] @ [13,TILE_B] -> [64,TILE_B], f32 MXU accumulation.
    h1 = jnp.dot(w1_ref[...], x, preferred_element_type=jnp.float32)
    h1 = jnp.maximum(h1 + b1_ref[...], 0.0)            # bias: [64,1] lane-broadcast

    # Layer 2: [64,64] @ [64,TILE_B] -> [64,TILE_B]
    h2 = jnp.dot(w2_ref[...], h1.astype(jnp.bfloat16),
                 preferred_element_type=jnp.float32)
    h2 = jnp.maximum(h2 + b2_ref[...], 0.0)

    # Layer 3: [1,64] @ [64,TILE_B] -> lane-dense [1,TILE_B]
    out = jnp.dot(w3_ref[...], h2.astype(jnp.bfloat16),
                  preferred_element_type=jnp.float32)
    o_ref[...] = out + b3_ref[0, 0]                     # b3 scalar from SMEM


def high_deterministic_nn(x, params, max_tile_b=1024):
    """Forward pass of HighDeterministicNN.

    x: [B, 13] float32
    params: dict with w1 [64,13], b1 [64,1], w2 [64,64], b2 [64,1],
            w3 [1,64], b3 [1,1]   (PyTorch-native [out, in] weights)
    returns: [B, 1] float32
    """
    B, F = x.shape
    assert F == 13, f"expected 13 input features, got {F}"

    # Batch tile: multiple of 128 (lane width); large tiles for big batches.
    tile_b = min(max_tile_b, pl.cdiv(B, 128) * 128)
    b_pad = pl.cdiv(B, tile_b) * tile_b
    grid = (b_pad // tile_b,)

    # Feature-major, zero-padded on the batch axis, bf16 for the MXU + half the
    # input HBM traffic.  (Padded columns produce values that are sliced away.)
    x_t = jnp.pad(x.T, ((0, 0), (0, b_pad - B))).astype(jnp.bfloat16)

    w1 = params["w1"].astype(jnp.bfloat16)
    w2 = params["w2"].astype(jnp.bfloat16)
    w3 = params["w3"].astype(jnp.bfloat16)
    b1, b2, b3 = params["b1"], params["b2"], params["b3"]

    const = lambda i: (0, 0)   # weights/biases: resident across the whole grid
    out = pl.pallas_call(
        _mlp_kernel,
        out_shape=jax.ShapeDtypeStruct((1, b_pad), jnp.float32),
        grid=grid,
        in_specs=[
            pl.BlockSpec((13, tile_b), lambda i: (0, i)),   # x tile (lane-dense)
            pl.BlockSpec((64, 13), const),                  # w1
            pl.BlockSpec((64, 1), const),                   # b1
            pl.BlockSpec((64, 64), const),                  # w2
            pl.BlockSpec((64, 1), const),                   # b2
            pl.BlockSpec((1, 64), const),                   # w3
            pl.BlockSpec(memory_space=pltpu.MemorySpace.SMEM),  # b3 scalar
        ],
        out_specs=pl.BlockSpec((1, tile_b), lambda i: (0, i)),  # lane-dense out
        compiler_params=pltpu.CompilerParams(
            dimension_semantics=("parallel",),          # megacore on v7x
            vmem_limit_bytes=32 * 1024 * 1024,          # safe on v5e/v6e/v7x
        ),
    )(x_t, w1, b1, w2, b2, w3, b3)

    return out[0, :B].reshape(B, 1)


def init_params(key):
    """Deterministic init mimicking PyTorch's default Linear init
    (uniform in [-1/sqrt(fan_in), 1/sqrt(fan_in)]), stored [out, in]."""
    def linear(key, fan_in, fan_out):
        kw, kb = jax.random.split(key)
        bound = 1.0 / jnp.sqrt(jnp.float32(fan_in))
        w = jax.random.uniform(kw, (fan_out, fan_in), jnp.float32, -bound, bound)
        b = jax.random.uniform(kb, (fan_out, 1), jnp.float32, -bound, bound)
        return w, b

    k1, k2, k3 = jax.random.split(key, 3)
    w1, b1 = linear(k1, 13, 64)
    w2, b2 = linear(k2, 64, 64)
    w3, b3 = linear(k3, 64, 1)
    return {"w1": w1, "b1": b1, "w2": w2, "b2": b2, "w3": w3, "b3": b3}


def reference_forward(x, params):
    """Pure-JAX reference using the same bf16-operand / f32-accumulate numerics."""
    xb = x.astype(jnp.bfloat16)
    w1 = params["w1"].astype(jnp.bfloat16)
    w2 = params["w2"].astype(jnp.bfloat16)
    w3 = params["w3"].astype(jnp.bfloat16)
    h1 = jnp.dot(xb, w1.T, preferred_element_type=jnp.float32) + params["b1"].reshape(1, -1)
    h1 = jnp.maximum(h1, 0.0)
    h2 = jnp.dot(h1.astype(jnp.bfloat16), w2.T, preferred_element_type=jnp.float32) \
        + params["b2"].reshape(1, -1)
    h2 = jnp.maximum(h2, 0.0)
    out = jnp.dot(h2.astype(jnp.bfloat16), w3.T, preferred_element_type=jnp.float32) \
        + params["b3"].reshape(1, 1)
    return out


if __name__ == "__main__":
    key = jax.random.PRNGKey(0)
    k_params, k_x, k_x2 = jax.random.split(key, 3)
    params = init_params(k_params)

    # Small batch consistent with the module (features = 13).
    x = jax.random.normal(k_x, (8, 13), dtype=jnp.float32)
    out = jax.block_until_ready(high_deterministic_nn(x, params))
    ref = reference_forward(x, params)
    assert out.shape == (8, 1)
    assert jnp.allclose(out, ref, atol=1e-3, rtol=1e-3), \
        float(jnp.max(jnp.abs(out - ref)))

    # Larger, non-multiple batch: exercises the tiled grid + padding path.
    x2 = jax.random.normal(k_x2, (3000, 13), dtype=jnp.float32)
    out2 = jax.block_until_ready(high_deterministic_nn(x2, params, max_tile_b=1024))
    ref2 = reference_forward(x2, params)
    assert out2.shape == (3000, 1)
    assert jnp.allclose(out2, ref2, atol=1e-3, rtol=1e-3), \
        float(jnp.max(jnp.abs(out2 - ref2)))

    print("KERNEL_OK")
</pallas_src>

<mosaic_0001>
module attributes {stable_mosaic.version = 11 : i64} {
  func.func @_mlp_kernel(%arg0: i32, %arg1: memref<13x128xbf16, #tpu.memory_space<vmem>>, %arg2: memref<64x13xbf16, #tpu.memory_space<vmem>>, %arg3: memref<64x1xf32, #tpu.memory_space<vmem>>, %arg4: memref<64x64xbf16, #tpu.memory_space<vmem>>, %arg5: memref<64x1xf32, #tpu.memory_space<vmem>>, %arg6: memref<1x64xbf16, #tpu.memory_space<vmem>>, %arg7: memref<1x1xf32, #tpu.memory_space<smem>>, %arg8: memref<1x128xf32, #tpu.memory_space<vmem>>) attributes {dimension_semantics = [#tpu.dimension_semantics<parallel>], iteration_bounds = array<i64: 1>, scalar_prefetch = 0 : i64, scratch_operands = 0 : i64, tpu.core_type = #tpu.core_type<tc>, window_params = [{transform_indices = @transform_0, window_bounds = array<i64: 13, 128>}, {pipeline_mode = #tpu.pipeline_mode<synchronous>, transform_indices = @transform_1, window_bounds = array<i64: 64, 13>}, {pipeline_mode = #tpu.pipeline_mode<synchronous>, transform_indices = @transform_2, window_bounds = array<i64: 64, 1>}, {pipeline_mode = #tpu.pipeline_mode<synchronous>, transform_indices = @transform_3, window_bounds = array<i64: 64, 64>}, {pipeline_mode = #tpu.pipeline_mode<synchronous>, transform_indices = @transform_4, window_bounds = array<i64: 64, 1>}, {pipeline_mode = #tpu.pipeline_mode<synchronous>, transform_indices = @transform_5, window_bounds = array<i64: 1, 64>}, {transform_indices = @transform_6, window_bounds = array<i64: 1, 1>}, {transform_indices = @transform_7, window_bounds = array<i64: 1, 128>}]} {
    %c0 = arith.constant 0 : index
    %c0_0 = arith.constant 0 : index
    %0 = vector.load %arg1[%c0, %c0_0] : memref<13x128xbf16, #tpu.memory_space<vmem>>, vector<13x128xbf16>
    %c0_1 = arith.constant 0 : index
    %c0_2 = arith.constant 0 : index
    %1 = vector.load %arg2[%c0_1, %c0_2] : memref<64x13xbf16, #tpu.memory_space<vmem>>, vector<64x13xbf16>
    %cst = arith.constant dense<0.000000e+00> : vector<64x128xf32>
    %2 = tpu.matmul %1, %0, %cst {dimension_numbers = #tpu.dot_dimension_numbers<[1], [0], [0], [1], [0, 0, 1, 1], [], []>} : vector<64x13xbf16>, vector<13x128xbf16>, vector<64x128xf32> -> vector<64x128xf32>
    %c0_3 = arith.constant 0 : index
    %c0_4 = arith.constant 0 : index
    %3 = vector.load %arg3[%c0_3, %c0_4] : memref<64x1xf32, #tpu.memory_space<vmem>>, vector<64x1xf32>
    %4 = vector.broadcast %3 : vector<64x1xf32> to vector<64x128xf32>
    %5 = arith.addf %2, %4 : vector<64x128xf32>
    %cst_5 = arith.constant 0.000000e+00 : f32
    %6 = vector.broadcast %cst_5 : f32 to vector<64x128xf32>
    %7 = arith.maximumf %5, %6 : vector<64x128xf32>
    %c0_6 = arith.constant 0 : index
    %c0_7 = arith.constant 0 : index
    %8 = vector.load %arg4[%c0_6, %c0_7] : memref<64x64xbf16, #tpu.memory_space<vmem>>, vector<64x64xbf16>
    %9 = arith.truncf %7 : vector<64x128xf32> to vector<64x128xbf16>
    %cst_8 = arith.constant dense<0.000000e+00> : vector<64x128xf32>
    %10 = tpu.matmul %8, %9, %cst_8 {dimension_numbers = #tpu.dot_dimension_numbers<[1], [0], [0], [1], [0, 0, 1, 1], [], []>} : vector<64x64xbf16>, vector<64x128xbf16>, vector<64x128xf32> -> vector<64x128xf32>
    %c0_9 = arith.constant 0 : index
    %c0_10 = arith.constant 0 : index
    %11 = vector.load %arg5[%c0_9, %c0_10] : memref<64x1xf32, #tpu.memory_space<vmem>>, vector<64x1xf32>
    %12 = vector.broadcast %11 : vector<64x1xf32> to vector<64x128xf32>
    %13 = arith.addf %10, %12 : vector<64x128xf32>
    %cst_11 = arith.constant 0.000000e+00 : f32
    %14 = vector.broadcast %cst_11 : f32 to vector<64x128xf32>
    %15 = arith.maximumf %13, %14 : vector<64x128xf32>
    %c0_12 = arith.constant 0 : index
    %c0_13 = arith.constant 0 : index
    %16 = vector.load %arg6[%c0_12, %c0_13] : memref<1x64xbf16, #tpu.memory_space<vmem>>, vector<1x64xbf16>
    %17 = arith.truncf %15 : vector<64x128xf32> to vector<64x128xbf16>
    %cst_14 = arith.constant dense<0.000000e+00> : vector<1x128xf32>
    %18 = tpu.matmul %16, %17, %cst_14 {dimension_numbers = #tpu.dot_dimension_numbers<[1], [0], [0], [1], [0, 0, 1, 1], [], []>} : vector<1x64xbf16>, vector<64x128xbf16>, vector<1x128xf32> -> vector<1x128xf32>
    %c0_15 = arith.constant 0 : index
    %c0_16 = arith.constant 0 : index
    %19 = memref.load %arg7[%c0_15, %c0_16] : memref<1x1xf32, #tpu.memory_space<smem>>
    %20 = vector.broadcast %19 : f32 to vector<1x128xf32>
    %21 = arith.addf %18, %20 : vector<1x128xf32>
    %c0_17 = arith.constant 0 : index
    %c0_18 = arith.constant 0 : index
    %22 = vector.load %arg8[%c0_17, %c0_18] : memref<1x128xf32, #tpu.memory_space<vmem>>, vector<1x128xf32>
    tpu.vector_store %arg8[%c0_17, %c0_18], %21 {strides = array<i32>} : memref<1x128xf32, #tpu.memory_space<vmem>>, vector<1x128xf32>,
    return
  }
  func.func @transform_0(%arg0: i32) -> (i32, i32) {
    %c0_i32 = arith.constant 0 : i32
    %c0_i32_0 = arith.constant 0 : i32
    return %c0_i32, %arg0 : i32, i32
  }
  func.func @transform_1(%arg0: i32) -> (i32, i32) {
    %c0_i32 = arith.constant 0 : i32
    %c0_i32_0 = arith.constant 0 : i32
    %c0_i32_1 = arith.constant 0 : i32
    return %c0_i32, %c0_i32_0 : i32, i32
  }
  func.func @transform_2(%arg0: i32) -> (i32, i32) {
    %c0_i32 = arith.constant 0 : i32
    %c0_i32_0 = arith.constant 0 : i32
    %c0_i32_1 = arith.constant 0 : i32
    return %c0_i32, %c0_i32_0 : i32, i32
  }
  func.func @transform_3(%arg0: i32) -> (i32, i32) {
    %c0_i32 = arith.constant 0 : i32
    %c0_i32_0 = arith.constant 0 : i32
    %c0_i32_1 = arith.constant 0 : i32
    return %c0_i32, %c0_i32_0 : i32, i32
  }
  func.func @transform_4(%arg0: i32) -> (i32, i32) {
    %c0_i32 = arith.constant 0 : i32
    %c0_i32_0 = arith.constant 0 : i32
    %c0_i32_1 = arith.constant 0 : i32
    return %c0_i32, %c0_i32_0 : i32, i32
  }
  func.func @transform_5(%arg0: i32) -> (i32, i32) {
    %c0_i32 = arith.constant 0 : i32
    %c0_i32_0 = arith.constant 0 : i32
    %c0_i32_1 = arith.constant 0 : i32
    return %c0_i32, %c0_i32_0 : i32, i32
  }
  func.func @transform_6(%arg0: i32) -> (i32, i32) {
    %c0_i32 = arith.constant 0 : i32
    %c0_i32_0 = arith.constant 0 : i32
    %c0_i32_1 = arith.constant 0 : i32
    return %c0_i32, %c0_i32_0 : i32, i32
  }
  func.func @transform_7(%arg0: i32) -> (i32, i32) {
    %c0_i32 = arith.constant 0 : i32
    %c0_i32_0 = arith.constant 0 : i32
    return %c0_i32, %arg0 : i32, i32
  }
}

</mosaic_0001>

<bundles_post_ra>
// kernel: tpu_custom_call.1
= control target key start
LH: loop header
LB: loop body
LE: loop exit
PB: predicated region body
PF: predicated region fallthrough
CT: control target
= control target key end

     0   :  { %vm125_vm0 = vcmask 1045504   ;;  %vm126_vm1 = vcmask 1046528   ;;  %v550_v2 = vmov 65535   ;;  %vm112_vm2 = vcmask 105472   ;;  %s697_s0 = inlined_call_operand.vmem [shape: bf16[13,128], index: 0, kind: input, shape index: {}]   ;;  %s698_s1 = inlined_call_operand.vmem [shape: bf16[64,13], index: 1, kind: input, shape index: {}]   ;;  %s699_s2 = inlined_call_operand.vmem [shape: f32[64,1], index: 2, kind: input, shape index: {}]   ;;  %s700_s3 = inlined_call_operand.vmem [shape: bf16[64,64], index: 3, kind: input, shape index: {}]   ;;  %s701_s4 = inlined_call_operand.vmem [shape: f32[64,1], index: 4, kind: input, shape index: {}]   ;;  %s702_s5 = inlined_call_operand.vmem [shape: bf16[1,64], index: 5, kind: input, shape index: {}]   ;;  %s703_s6 = inlined_call_operand.<no memory space> [shape: f32[1,1], index: 6, kind: input, shape index: {}]   ;;  %s704_s7 = inlined_call_operand.hbm [shape: f32[1,128], index: 7, kind: output, shape index: {}]  }
   0x1   :  { %v517_v0 = vld [vmem:[%s697_s0] sm:$0x7f]   ;;  %v127_v3 = vsel %vm125_vm0, 4294967295, %v550_v2  ;;  %v551_v6 = vmov 0   ;;  %v519_v8 = vld [vmem:[%s698_s1 + $0x8] sm:$0xff]   ;;  %v41_v9 = vld [vmem:[%s699_s2 + $0x10] sm:$0xff] }
   0x2   :  { %v518_v1 = vld [vmem:[%s698_s1] sm:$0xff]   ;;  %v128_v4 = vsel %vm126_vm1, %v127_v3, 0  ;;  %515 = vset.pattern.permute.xlu0 %v551_v6  ;;  %516 = vset.pattern.permute.xlu1 %v551_v6  ;;  %v520_v10 = vld [vmem:[%s698_s1 + $0x10] sm:$0xff]   ;;  %v40_v11 = vld [vmem:[%s699_s2 + $0x8] sm:$0xff] }
   0x3   :  { %474 = vmatprep.mubr.msk.bf16.mxu0 %vm112_vm2, %v518_v1  ;;  %v130_v5 = vand.u32 %v517_v0, %v128_v4  ;;  %v39_v7 = vld [vmem:[%s699_s2] sm:$0xff]  ;;  %59 = vperm.xlu1 %516, %v41_v9   ;;  %v42_v12 = vld [vmem:[%s699_s2 + $0x18] sm:$0xff]  ;;  %v44_v14 = vld [vmem:[%s699_s2 + $0x28] sm:$0xff] }
   0x4   :  { %49 = vperm.xlu0 %515, %v39_v7   ;;  %v43_v13 = vld [vmem:[%s699_s2 + $0x20] sm:$0xff] }
   0x5   :  { %472 = vmatprep.subr.bf16.mxu0 %v130_v5 }
   0x6   :  { %473 = vmatpush3.bf16.msra.mxu0 %v130_v5 }
   0x7   :  { %64 = vperm.xlu1 %516, %v42_v12  }
   0x8   :  { %54 = vperm.xlu0 %515, %v40_v11  }
   0x9   :  { %475 = vmatmul.mubr.msk.bf16.vlgmr.msra.gmra.mrb[0].mxu0 %vm112_vm2, %v519_v8 }
   0xa   :  { %478 = vmatprep.mubr.msk.bf16.mxu0 %vm112_vm2, %v520_v10 }
   0xb   :  { %13 = vsyncpa [#allocation4], 0  ;;  %v521_v15 = vld [vmem:[%s698_s1 + $0x18] sm:$0xff]   ;;  %74 = vperm.xlu1 %516, %v44_v14   ;;  %v45_v16 = vld [vmem:[%s699_s2 + $0x30] sm:$0xff]  ;;  %vm285_vm3 = vcmask 523264   ;;  %v552_v2 = vmov 0.0  }
   0xc   :  { %69 = vperm.xlu0 %515, %v43_v13   ;;  %v46_v17 = vld [vmem:[%s699_s2 + $0x38] sm:$0xff]  ;;  %v217_v18 = vld [vmem:[%s701_s4] sm:$0xff]  ;;  %v218_v19 = vld [vmem:[%s701_s4 + $0x8] sm:$0xff]  ;;  %498 = vmatprep.subr.bf16.mxu0 %v552_v2  ;;  %vm553_vm4 = vmmov 0   ;;  %s554_s26 = smov [#allocation3]  }
   0xd   :  { %v219_v20 = vld [vmem:[%s701_s4 + $0x10] sm:$0xff]  ;;  %v220_v21 = vld [vmem:[%s701_s4 + $0x18] sm:$0xff]  ;;  %v221_v22 = vld [vmem:[%s701_s4 + $0x20] sm:$0xff]  ;;  %s428_s27 = sshll.u32 %s554_s26, 4  ;;  %s429_s27 = int_to_ptr.vmem [resolvable:$true] %s428_s27 }
   0xe   :  { %v222_v23 = vld [vmem:[%s701_s4 + $0x28] sm:$0xff]  ;;  %v223_v24 = vld [vmem:[%s701_s4 + $0x30] sm:$0xff]  ;;  %v224_v25 = vld [vmem:[%s701_s4 + $0x38] sm:$0xff]  ;;  %s526_s28 = scalar_lea.vmem %s429_s27, 16  ;;  %s530_s1 = scalar_lea.vmem %s429_s27, 32 }
   0xf   :  { %84 = vperm.xlu1 %516, %v46_v17   ;;  %v522_v26 = vld [vmem:[%s700_s3] sm:$0xff]   ;;  %v523_v63 = vld [vmem:[%s700_s3 + $0x8] sm:$0xff]   ;;  %v524_v0 = vld [vmem:[%s700_s3 + $0x10] sm:$0xff]   ;;  %p527_p0 = scmp.ne.s32.totalorder %s429_s27, %s526_s28  ;;  %p531_p1 = scmp.lt.s32.totalorder %s429_s27, %s429_s27 }
  0x10   :  { %79 = vperm.xlu0 %515, %v45_v16   ;;  %490 = vmatprep.mubr.msk.bf16.mxu1 %vm285_vm3, %v522_v26  ;;  %v525_v1 = vld [vmem:[%s700_s3 + $0x18] sm:$0xff]   ;;  %p532_p2 = scmp.lt.s32.totalorder %s530_s1, %s526_s28 }
  0x11   :  { %479 = vmatmul.mubr.msk.bf16.gmra.mrb[4].mxu0 %vm112_vm2, %v521_v15 }
  0x12   :  { %506 = vmatprep.mubr.msk.bf16.mxu0 %vm553_vm4, %v552_v2  ;;  %p533_p3 = por %p532_p2, %p531_p1 }
  0x13   :  { %232 = vperm.xlu1 %516, %v218_v19  }
  0x14   :  { %227 = vperm.xlu0 %515, %v217_v18   ;;  %p534_p4 = pnand %p533_p3, %p527_p0 }
  0x17   :  { %242 = vperm.xlu1 %516, %v220_v21  }
  0x18   :  { %237 = vperm.xlu0 %515, %v219_v20  }
  0x1b   :  { %252 = vperm.xlu1 %516, %v222_v23  }
  0x1c   :  { %247 = vperm.xlu0 %515, %v221_v22  }
  0x1f   :  { %262 = vperm.xlu1 %516, %v224_v25  }
  0x20   :  { %257 = vperm.xlu0 %515, %v223_v24  }
  0x82   :  { %v60_v28 = vpop.permute.xlu1 %59 }
  0x83   :  { %v50_v27 = vpop.permute.xlu0 %49 }
  0x86   :  { %v65_v30 = vpop.permute.xlu1 %64 }
  0x87   :  { %v55_v29 = vpop.permute.xlu0 %54 }
  0x8a   :  { %v75_v39 = vpop.permute.xlu1 %74 }
  0x8b   :  { %v70_v34 = vpop.permute.xlu0 %69 }
  0x8e   :  { %v85_v51 = vpop.permute.xlu1 %84 }
  0x8f   :  { %v80_v46 = vpop.permute.xlu0 %79 }
  0x92   :  { %v233_v4 = vpop.permute.xlu1 %232 }
  0x93   :  { %v228_v3 = vpop.permute.xlu0 %227 }
  0x96   :  { %v243_v6 = vpop.permute.xlu1 %242 }
  0x97   :  { %v238_v5 = vpop.permute.xlu0 %237 }
  0x9a   :  { %v253_v15 = vpop.permute.xlu1 %252 }
  0x9b   :  { %v248_v10 = vpop.permute.xlu0 %247 }
  0x9f   :  { %v258_v22 = vpop.permute.xlu0 %257 }
  0xdc   :  { %v476_v31 = vpop.f32.mrb[0].mxu0 }
  0xdd   :  { %v175_v32 = vadd.f32 %v476_v31, %v60_v28  ;;  %v166_v33 = vpop.f32.mrb[1].mxu0 }
  0xde   :  { %v167_v35 = vadd.f32 %v166_v33, %v50_v27  ;;  %v477_v36 = vpop.f32.mrb[2].mxu0  ;;  %v263_v27 = vpop.permute.xlu1 %262 }
  0xdf   :  { %v178_v37 = vadd.f32 %v477_v36, %v65_v30  ;;  %v169_v38 = vpop.f32.mrb[3].mxu0  ;;  %v199_v41 = vmax.f32 %v175_v32, 0.0 }
  0xe0   :  { %v170_v40 = vadd.f32 %v169_v38, %v55_v29  ;;  %v197_v43 = vmax.f32 %v167_v35, 0.0 }
  0xe1   :  { %v200_v42 = vmax.f32 %v178_v37, 0.0 }
  0xe2   :  { %v198_v44 = vmax.f32 %v170_v40, 0.0  ;;  %v377_v40 = vstv %s703_s6 }
  0xe3   :  { %v214_v45 = vpack.c.bf16 %v200_v42, %v199_v41 }
  0xe4   :  { %v480_v47 = vpop.f32.mrb[4].mxu0  ;;  %v213_v48 = vpack.c.bf16 %v198_v44, %v197_v43 }
  0xe5   :  { %v191_v49 = vadd.f32 %v480_v47, %v80_v46  ;;  %v182_v50 = vpop.f32.mrb[5].mxu0 }
  0xe6   :  { %v183_v52 = vadd.f32 %v182_v50, %v70_v34  ;;  %v481_v53 = vpop.f32.mrb[6].mxu0  ;;  %482 = vmatprep.subr.bf16.mxu1 %v213_v48 }
  0xe7   :  { %v194_v54 = vadd.f32 %v481_v53, %v85_v51  ;;  %v185_v55 = vpop.f32.mrb[7].mxu0  ;;  %483 = vmatpush3.bf16.msra.mxu1 %v213_v48  ;;  %v203_v57 = vmax.f32 %v191_v49, 0.0 }
  0xe8   :  { %v186_v56 = vadd.f32 %v185_v55, %v75_v39  ;;  %484 = vmatprep.subr.bf16.mxu1 %v214_v45  ;;  %v201_v59 = vmax.f32 %v183_v52, 0.0  ;;  %v371_v39 = vld [vmem:[%s702_s5] sm:$0x1] }
  0xe9   :  { %v204_v58 = vmax.f32 %v194_v54, 0.0 }
  0xea   :  { %v202_v60 = vmax.f32 %v186_v56, 0.0 }
  0xeb   :  { %v216_v61 = vpack.c.bf16 %v204_v58, %v203_v57  ;;  %485 = vmatpush3.bf16.msra.mxu1 %v214_v45 }
  0xec   :  { %v215_v62 = vpack.c.bf16 %v202_v60, %v201_v59 }
  0xee   :  { %486 = vmatprep.subr.bf16.mxu1 %v215_v62 }
  0xef   :  { %487 = vmatpush3.bf16.msra.mxu1 %v215_v62 }
  0xf0   :  { %488 = vmatprep.subr.bf16.mxu1 %v216_v61 }
  0xf3   :  { %489 = vmatpush3.bf16.msra.mxu1 %v216_v61 }
  0xf6   :  { %491 = vmatmul.mubr.msk.bf16.vlgmr.msra.gmra.mrb[0].mxu1 %vm285_vm3, %v523_v63 }
  0xf7   :  { %494 = vmatprep.mubr.msk.bf16.mxu1 %vm285_vm3, %v524_v0 }
  0xfe   :  { %495 = vmatmul.mubr.msk.bf16.gmra.mrb[4].mxu1 %vm285_vm3, %v525_v1 }
 0x1c9   :  { %v492_v7 = vpop.f32.mrb[0].mxu1 }
 0x1ca   :  { %v341_v8 = vadd.f32 %v492_v7, %v238_v5  ;;  %v332_v9 = vpop.f32.mrb[1].mxu1 }
 0x1cb   :  { %v333_v11 = vadd.f32 %v332_v9, %v228_v3  ;;  %v493_v12 = vpop.f32.mrb[2].mxu1 }
 0x1cc   :  { %v344_v13 = vadd.f32 %v493_v12, %v243_v6  ;;  %v335_v14 = vpop.f32.mrb[3].mxu1  ;;  %v365_v17 = vmax.f32 %v341_v8, 0.0 }
 0x1cd   :  { %v336_v16 = vadd.f32 %v335_v14, %v233_v4  ;;  %v363_v19 = vmax.f32 %v333_v11, 0.0 }
 0x1ce   :  { %v366_v18 = vmax.f32 %v344_v13, 0.0 }
 0x1cf   :  { %v364_v20 = vmax.f32 %v336_v16, 0.0 }
 0x1d0   :  { %v373_v21 = vpack.c.bf16 %v366_v18, %v365_v17 }
 0x1d1   :  { %v372_v23 = vpack.c.bf16 %v364_v20, %v363_v19  ;;  %v496_v24 = vpop.f32.mrb[4].mxu1 }
 0x1d2   :  { %v357_v25 = vadd.f32 %v496_v24, %v258_v22  ;;  %v348_v26 = vpop.f32.mrb[5].mxu1 }
 0x1d3   :  { %v349_v28 = vadd.f32 %v348_v26, %v248_v10  ;;  %v497_v29 = vpop.f32.mrb[6].mxu1  ;;  %499 = vmatpush3.bf16.msra.mxu0 %v372_v23 }
 0x1d4   :  { %v360_v30 = vadd.f32 %v497_v29, %v263_v27  ;;  %v351_v31 = vpop.f32.mrb[7].mxu1  ;;  %500 = vmatprep.subr.bf16.mxu0 %v552_v2  ;;  %v369_v33 = vmax.f32 %v357_v25, 0.0 }
 0x1d5   :  { %v352_v32 = vadd.f32 %v351_v31, %v253_v15  ;;  %v367_v35 = vmax.f32 %v349_v28, 0.0 }
 0x1d6   :  { %v370_v34 = vmax.f32 %v360_v30, 0.0 }
 0x1d7   :  { %v368_v36 = vmax.f32 %v352_v32, 0.0  ;;  %501 = vmatpush3.bf16.msra.mxu0 %v373_v21 }
 0x1d8   :  { %v375_v37 = vpack.c.bf16 %v370_v34, %v369_v33  ;;  %502 = vmatprep.subr.bf16.mxu0 %v552_v2 }
 0x1d9   :  { %v374_v38 = vpack.c.bf16 %v368_v36, %v367_v35 }
 0x1db   :  { %503 = vmatpush3.bf16.msra.mxu0 %v374_v38 }
 0x1dc   :  { %504 = vmatprep.subr.bf16.mxu0 %v552_v2 }
 0x1df   :  { %505 = vmatpush3.bf16.msra.mxu0 %v375_v37 }
 0x1e2   :  { %507 = vmatmul.mubr.msk.bf16.vlgmr.msra.gmra.mrb[8].mxu0 %vm285_vm3, %v371_v39 }
 0x2b5   :  { %v415_v41 = vpop.f32.mrb[8].mxu0 }
 0x2b6   :  { %v416_v42 = vadd.f32 %v415_v41, %v377_v40  ;;  %v508_v43 = vpop.f32.mrb[9].mxu0 }
 0x2b7   :  { %v418_v44 = vpop.f32.mrb[10].mxu0 }
 0x2b8   :  { %421 = vst [vmem:[#allocation3] sm:$0x1] %v416_v42  ;;  %v509_v45 = vpop.f32.mrb[11].mxu0 }
 0x2b9   :  { %537 = shalt.err (!%p534_p4)
}
 0x2ba   :  { %s538_s6 = scalar_lea.hbm %s704_s7, 16 }
 0x2bb   :  { %p539_p5 = scmp.ne.s32.totalorder %s704_s7, %s538_s6  ;;  %p542_p6 = scmp.lt.u32.totalorder %s538_s6, %s704_s7 }
 0x2bd   :  { %p544_p7 = pnand %p542_p6, %p539_p5 }
 0x2bf   :  { %547 = shalt.err (!%p544_p7)
}
 0x2c0   :  { %431 = dma.vmem_to_hbm [thread:$0]  %s429_s27, 16, %s704_s7, [#allocation4]  }
 0x2c1   :  { %548 = dma.done.wait [#allocation4], 16  }
 0x2c2   :  { %549 = vsyncadd [#allocation4], 4294967280 }
 0x2c3   :  { %435 = vsyncpa [#allocation4], 1 }

</bundles_post_ra>
